<compile_context>
chip_gen: v7x
topology: tpu7x:2x2x1
jax: 0.10.0
libtpu: 0.0.40
codegen_flags: <defaults>
</compile_context>

<pallas_src>
import jax
import jax.numpy as jnp
from jax.experimental import pallas as pl
from jax.experimental.pallas import tpu as pltpu

EPS = 1e-5
_VMEM = pl.BlockSpec(memory_space=pltpu.MemorySpace.VMEM)
_CPARAMS = pltpu.CompilerParams(vmem_limit_bytes=32 * 1024 * 1024)


# ------------------------------ Pallas kernels ------------------------------

def _conv_pool_bn_sig_kernel(pT_ref, w_ref, b_ref, g_ref, beta_ref, o_ref):
    """Fused Conv2d + AvgPool2d(2) + BatchNorm2D(batch stats) + Sigmoid.

    pT_ref : (K, M) bf16  pooled-grid im2col patches, K = 4*Cin*k*k,
                          M = N*Hp*Wp (spatial on the 128-lane axis)
    w_ref  : (C, K) bf16  conv weight / 4, tiled over the 4 pool-window taps
    b/g/beta: (C, 1) f32  conv bias, BN gamma, BN beta
    o_ref  : (C, M) f32   lane-dense output
    """
    acc = jnp.dot(w_ref[...], pT_ref[...], preferred_element_type=jnp.float32)
    acc = acc + b_ref[...]
    # BatchNorm2D: per-channel stats over (N, Hp, Wp) == over the lane axis.
    mu = jnp.mean(acc, axis=-1, keepdims=True)
    var = jnp.mean((acc - mu) ** 2, axis=-1, keepdims=True)
    xhat = (acc - mu) * jax.lax.rsqrt(var + EPS)
    o_ref[...] = jax.nn.sigmoid(g_ref[...] * xhat + beta_ref[...])


def _mlp_head_kernel(x_ref,
                     w3_ref, b3_ref, g3_ref, be3_ref,
                     w4_ref, b4_ref, g4_ref, be4_ref,
                     w5_ref, b5_ref, o_ref):
    """Fused Linear+BN1D+Sigmoid x2, then Linear+Softmax; weights stay in VMEM."""
    def bn_sigmoid(h, g, b):
        mu = jnp.mean(h, axis=0, keepdims=True)
        var = jnp.mean((h - mu) ** 2, axis=0, keepdims=True)
        return jax.nn.sigmoid(g * (h - mu) * jax.lax.rsqrt(var + EPS) + b)

    h = jnp.dot(x_ref[...], w3_ref[...], preferred_element_type=jnp.float32)
    h = bn_sigmoid(h + b3_ref[...], g3_ref[...], be3_ref[...])

    h = jnp.dot(h.astype(w4_ref.dtype), w4_ref[...],
                preferred_element_type=jnp.float32)
    h = bn_sigmoid(h + b4_ref[...], g4_ref[...], be4_ref[...])

    z = jnp.dot(h.astype(w5_ref.dtype), w5_ref[...],
                preferred_element_type=jnp.float32) + b5_ref[...]
    z = z - jnp.max(z, axis=-1, keepdims=True)
    e = jnp.exp(z)
    o_ref[...] = e / jnp.sum(e, axis=-1, keepdims=True)


# ----------------------------- kernel wrappers -------------------------------

def conv_pool_bn_sigmoid(pT, w_rep, bias, gamma, beta):
    C = w_rep.shape[0]
    M = pT.shape[1]
    return pl.pallas_call(
        _conv_pool_bn_sig_kernel,
        out_shape=jax.ShapeDtypeStruct((C, M), jnp.float32),
        in_specs=[_VMEM] * 5,
        out_specs=_VMEM,
        compiler_params=_CPARAMS,
    )(pT, w_rep, bias, gamma, beta)


def mlp_head(x, kp):
    N = x.shape[0]
    return pl.pallas_call(
        _mlp_head_kernel,
        out_shape=jax.ShapeDtypeStruct((N, 10), jnp.float32),
        in_specs=[_VMEM] * 11,
        out_specs=_VMEM,
        compiler_params=_CPARAMS,
    )(x,
      kp["w3T"], kp["b3"], kp["bn3_g"], kp["bn3_b"],
      kp["w4T"], kp["b4"], kp["bn4_g"], kp["bn4_b"],
      kp["w5T"], kp["b5"])


# -------------------------------- JAX glue -----------------------------------

def pooled_patches_T(x, k, pad):
    """NHWC x -> (4*C*k*k, N*Hp*Wp) bf16 patch matrix for conv + AvgPool2d(2).

    The 2x2 pool-window offsets (dh, dw) are folded into the contraction dim,
    so the kernel's single matmul computes conv AND pool at once.
    K-index order is (dh, dw, ci, kh, kw) and matches the tiled weight layout
    built in prepare_params().
    """
    N, H, W, C = x.shape
    xp = jnp.pad(x, ((0, 0), (pad, pad), (pad, pad), (0, 0)))
    Ho = H + 2 * pad - k + 1
    Wo = W + 2 * pad - k + 1
    Hp, Wp = Ho // 2, Wo // 2
    taps = []
    for dh in range(2):
        for dw in range(2):
            for kh in range(k):
                for kw in range(k):
                    a, b = dh + kh, dw + kw
                    taps.append(
                        xp[:, a:a + 2 * Hp - 1:2, b:b + 2 * Wp - 1:2, :])
    p = jnp.stack(taps, axis=0)                      # (4*k*k, N, Hp, Wp, C)
    p = p.reshape(2, 2, k, k, N, Hp, Wp, C)
    p = jnp.transpose(p, (0, 1, 7, 2, 3, 4, 5, 6))   # (dh,dw,C,kh,kw,N,Hp,Wp)
    pT = p.reshape(4 * C * k * k, N * Hp * Wp).astype(jnp.bfloat16)
    return pT, Hp, Wp


# ------------------------------- parameters ----------------------------------

def init_params(key):
    ks = jax.random.split(key, 10)

    def uinit(k, shape, fan_in):
        bound = 1.0 / jnp.sqrt(fan_in)
        return jax.random.uniform(k, shape, jnp.float32, -bound, bound)

    p = {}
    p["w1"] = uinit(ks[0], (6, 1, 5, 5), 25)       # Conv2d(1, 6, 5, padding=2)
    p["b1"] = uinit(ks[1], (6,), 25)
    p["w2"] = uinit(ks[2], (16, 6, 5, 5), 150)     # Conv2d(6, 16, 5)
    p["b2"] = uinit(ks[3], (16,), 150)
    p["w3"] = uinit(ks[4], (120, 400), 400)        # Linear(400, 120)
    p["b3"] = uinit(ks[5], (120,), 400)
    p["w4"] = uinit(ks[6], (84, 120), 120)         # Linear(120, 84)
    p["b4"] = uinit(ks[7], (84,), 120)
    p["w5"] = uinit(ks[8], (10, 84), 84)           # Linear(84, 10)
    p["b5"] = uinit(ks[9], (10,), 84)
    for name, f in (("bn1", 6), ("bn2", 16), ("bn3", 120), ("bn4", 84)):
        p[f"{name}_g"] = jnp.ones((f,), jnp.float32)
        p[f"{name}_b"] = jnp.zeros((f,), jnp.float32)
    return p


def prepare_params(p):
    """One-time weight re-layout (hoisted out of the per-forward hot path)."""
    kp = {}
    # Conv weights: (Cout, Cin*k*k), scaled by 1/4 for the folded AvgPool and
    # tiled over the 4 pool-window offsets; bf16 for the MXU.
    w1 = p["w1"].reshape(6, 25)
    kp["w1_rep"] = jnp.tile(w1 * 0.25, (1, 4)).astype(jnp.bfloat16)   # (6, 100)
    w2 = p["w2"].reshape(16, 150)
    kp["w2_rep"] = jnp.tile(w2 * 0.25, (1, 4)).astype(jnp.bfloat16)   # (16, 600)
    kp["b1"] = p["b1"].reshape(6, 1)
    kp["b2"] = p["b2"].reshape(16, 1)
    kp["bn1_g"] = p["bn1_g"].reshape(6, 1)
    kp["bn1_b"] = p["bn1_b"].reshape(6, 1)
    kp["bn2_g"] = p["bn2_g"].reshape(16, 1)
    kp["bn2_b"] = p["bn2_b"].reshape(16, 1)
    # MLP head: (in, out) bf16 weights; (1, out) f32 bias / BN params.
    kp["w3T"] = p["w3"].T.astype(jnp.bfloat16)      # (400, 120)
    kp["w4T"] = p["w4"].T.astype(jnp.bfloat16)      # (120, 84)
    kp["w5T"] = p["w5"].T.astype(jnp.bfloat16)      # (84, 10)
    kp["b3"] = p["b3"].reshape(1, 120)
    kp["b4"] = p["b4"].reshape(1, 84)
    kp["b5"] = p["b5"].reshape(1, 10)
    kp["bn3_g"] = p["bn3_g"].reshape(1, 120)
    kp["bn3_b"] = p["bn3_b"].reshape(1, 120)
    kp["bn4_g"] = p["bn4_g"].reshape(1, 84)
    kp["bn4_b"] = p["bn4_b"].reshape(1, 84)
    return kp


# ------------------------------ forward pass ---------------------------------

def lenet_bn_forward(kp, x_nchw):
    # Input is NCHW like PyTorch; convert once to NHWC internally.
    x = jnp.transpose(x_nchw, (0, 2, 3, 1)).astype(jnp.float32)      # (N,28,28,1)
    N = x.shape[0]

    # --- block 1: Conv2d(1,6,5,pad=2) + AvgPool2d(2) + BN2D(6) + Sigmoid ---
    p1T, Hp1, Wp1 = pooled_patches_T(x, k=5, pad=2)                  # (100, N*196)
    a1 = conv_pool_bn_sigmoid(p1T, kp["w1_rep"], kp["b1"],
                              kp["bn1_g"], kp["bn1_b"])              # (6, N*196)

    # --- block 2: Conv2d(6,16,5) + AvgPool2d(2) + BN2D(16) + Sigmoid ---
    a1 = jnp.transpose(a1.reshape(6, N, Hp1, Wp1), (1, 2, 3, 0))     # (N,14,14,6)
    p2T, Hp2, Wp2 = pooled_patches_T(a1, k=5, pad=0)                 # (600, N*25)
    a2 = conv_pool_bn_sigmoid(p2T, kp["w2_rep"], kp["b2"],
                              kp["bn2_g"], kp["bn2_b"])              # (16, N*25)

    # --- flatten in PyTorch NCHW (C, H, W) order ---
    flat = jnp.transpose(a2.reshape(16, N, Hp2, Wp2),
                         (1, 0, 2, 3)).reshape(N, 16 * Hp2 * Wp2)    # (N, 400)

    # --- fused MLP head: Lin+BN+Sig, Lin+BN+Sig, Lin+Softmax (one kernel) ---
    return mlp_head(flat.astype(jnp.bfloat16), kp)                   # (N, 10)


# ---------------------------------- main --------------------------------------

if __name__ == "__main__":
    key = jax.random.PRNGKey(0)
    k_param, k_x = jax.random.split(key)
    params = prepare_params(init_params(k_param))

    # LeNet expects 28x28 single-channel images (conv/pool arithmetic forces it).
    x = jax.random.normal(k_x, (2, 1, 28, 28), jnp.float32)

    y = jax.jit(lenet_bn_forward)(params, x)
    y = jax.block_until_ready(y)

    assert y.shape == (2, 10), y.shape
    row_sums = jnp.sum(y, axis=1)
    assert bool(jnp.all(jnp.abs(row_sums - 1.0) < 1e-4)), row_sums
    assert bool(jnp.all(jnp.isfinite(y)))

    print("KERNEL_OK")
</pallas_src>

<mosaic_0001>
module attributes {stable_mosaic.version = 11 : i64} {
  func.func @_conv_pool_bn_sig_kernel(%arg0: memref<100x392xbf16, #tpu.memory_space<vmem>>, %arg1: memref<6x100xbf16, #tpu.memory_space<vmem>>, %arg2: memref<6x1xf32, #tpu.memory_space<vmem>>, %arg3: memref<6x1xf32, #tpu.memory_space<vmem>>, %arg4: memref<6x1xf32, #tpu.memory_space<vmem>>, %arg5: memref<6x392xf32, #tpu.memory_space<vmem>>) attributes {dimension_semantics = [], scalar_prefetch = 0 : i64, scratch_operands = 0 : i64, tpu.core_type = #tpu.core_type<tc>} {
    %c0 = arith.constant 0 : index
    %c0_0 = arith.constant 0 : index
    %0 = vector.load %arg1[%c0, %c0_0] : memref<6x100xbf16, #tpu.memory_space<vmem>>, vector<6x100xbf16>
    %c0_1 = arith.constant 0 : index
    %c0_2 = arith.constant 0 : index
    %1 = vector.load %arg0[%c0_1, %c0_2] : memref<100x392xbf16, #tpu.memory_space<vmem>>, vector<100x392xbf16>
    %cst = arith.constant dense<0.000000e+00> : vector<6x392xf32>
    %2 = tpu.matmul %0, %1, %cst {dimension_numbers = #tpu.dot_dimension_numbers<[1], [0], [0], [1], [0, 0, 1, 1], [], []>} : vector<6x100xbf16>, vector<100x392xbf16>, vector<6x392xf32> -> vector<6x392xf32>
    %c0_3 = arith.constant 0 : index
    %c0_4 = arith.constant 0 : index
    %3 = vector.load %arg2[%c0_3, %c0_4] : memref<6x1xf32, #tpu.memory_space<vmem>>, vector<6x1xf32>
    %4 = vector.broadcast %3 : vector<6x1xf32> to vector<6x392xf32>
    %5 = arith.addf %2, %4 : vector<6x392xf32>
    %cst_5 = arith.constant dense<0.000000e+00> : vector<6xf32>
    %6 = vector.multi_reduction <add>, %5, %cst_5 [1] : vector<6x392xf32> to vector<6xf32>
    %7 = vector.shape_cast %6 : vector<6xf32> to vector<6x1xf32>
    %cst_6 = arith.constant 3.920000e+02 : f32
    %8 = vector.broadcast %cst_6 : f32 to vector<6x1xf32>
    %9 = arith.divf %7, %8 : vector<6x1xf32>
    %10 = vector.broadcast %9 : vector<6x1xf32> to vector<6x392xf32>
    %11 = arith.subf %5, %10 : vector<6x392xf32>
    %12 = arith.mulf %11, %11 : vector<6x392xf32>
    %cst_7 = arith.constant dense<0.000000e+00> : vector<6xf32>
    %13 = vector.multi_reduction <add>, %12, %cst_7 [1] : vector<6x392xf32> to vector<6xf32>
    %14 = vector.shape_cast %13 : vector<6xf32> to vector<6x1xf32>
    %cst_8 = arith.constant 3.920000e+02 : f32
    %15 = vector.broadcast %cst_8 : f32 to vector<6x1xf32>
    %16 = arith.divf %14, %15 : vector<6x1xf32>
    %17 = vector.broadcast %9 : vector<6x1xf32> to vector<6x392xf32>
    %18 = arith.subf %5, %17 : vector<6x392xf32>
    %cst_9 = arith.constant 9.99999974E-6 : f32
    %19 = vector.broadcast %cst_9 : f32 to vector<6x1xf32>
    %20 = arith.addf %16, %19 : vector<6x1xf32>
    %21 = math.rsqrt %20 : vector<6x1xf32>
    %22 = vector.broadcast %21 : vector<6x1xf32> to vector<6x392xf32>
    %23 = arith.mulf %18, %22 : vector<6x392xf32>
    %c0_10 = arith.constant 0 : index
    %c0_11 = arith.constant 0 : index
    %24 = vector.load %arg3[%c0_10, %c0_11] : memref<6x1xf32, #tpu.memory_space<vmem>>, vector<6x1xf32>
    %25 = vector.broadcast %24 : vector<6x1xf32> to vector<6x392xf32>
    %26 = arith.mulf %25, %23 : vector<6x392xf32>
    %c0_12 = arith.constant 0 : index
    %c0_13 = arith.constant 0 : index
    %27 = vector.load %arg4[%c0_12, %c0_13] : memref<6x1xf32, #tpu.memory_space<vmem>>, vector<6x1xf32>
    %28 = vector.broadcast %27 : vector<6x1xf32> to vector<6x392xf32>
    %29 = arith.addf %26, %28 : vector<6x392xf32>
    %30 = arith.negf %29 : vector<6x392xf32>
    %31 = math.exp %30 : vector<6x392xf32>
    %cst_14 = arith.constant 1.000000e+00 : f32
    %32 = vector.broadcast %cst_14 : f32 to vector<6x392xf32>
    %33 = arith.addf %32, %31 : vector<6x392xf32>
    %34 = arith.divf %32, %33 : vector<6x392xf32>
    %c0_15 = arith.constant 0 : index
    %c0_16 = arith.constant 0 : index
    %35 = vector.load %arg5[%c0_15, %c0_16] : memref<6x392xf32, #tpu.memory_space<vmem>>, vector<6x392xf32>
    tpu.vector_store %arg5[%c0_15, %c0_16], %34 {strides = array<i32>} : memref<6x392xf32, #tpu.memory_space<vmem>>, vector<6x392xf32>,
    return
  }
}

module attributes {stable_mosaic.version = 11 : i64} {
  func.func @_conv_pool_bn_sig_kernel(%arg0: memref<600x50xbf16, #tpu.memory_space<vmem>>, %arg1: memref<16x600xbf16, #tpu.memory_space<vmem>>, %arg2: memref<16x1xf32, #tpu.memory_space<vmem>>, %arg3: memref<16x1xf32, #tpu.memory_space<vmem>>, %arg4: memref<16x1xf32, #tpu.memory_space<vmem>>, %arg5: memref<16x50xf32, #tpu.memory_space<vmem>>) attributes {dimension_semantics = [], scalar_prefetch = 0 : i64, scratch_operands = 0 : i64, tpu.core_type = #tpu.core_type<tc>} {
    %c0 = arith.constant 0 : index
    %c0_0 = arith.constant 0 : index
    %0 = vector.load %arg1[%c0, %c0_0] : memref<16x600xbf16, #tpu.memory_space<vmem>>, vector<16x600xbf16>
    %c0_1 = arith.constant 0 : index
    %c0_2 = arith.constant 0 : index
    %1 = vector.load %arg0[%c0_1, %c0_2] : memref<600x50xbf16, #tpu.memory_space<vmem>>, vector<600x50xbf16>
    %cst = arith.constant dense<0.000000e+00> : vector<16x50xf32>
    %2 = tpu.matmul %0, %1, %cst {dimension_numbers = #tpu.dot_dimension_numbers<[1], [0], [0], [1], [0, 0, 1, 1], [], []>} : vector<16x600xbf16>, vector<600x50xbf16>, vector<16x50xf32> -> vector<16x50xf32>
    %c0_3 = arith.constant 0 : index
    %c0_4 = arith.constant 0 : index
    %3 = vector.load %arg2[%c0_3, %c0_4] : memref<16x1xf32, #tpu.memory_space<vmem>>, vector<16x1xf32>
    %4 = vector.broadcast %3 : vector<16x1xf32> to vector<16x50xf32>
    %5 = arith.addf %2, %4 : vector<16x50xf32>
    %cst_5 = arith.constant dense<0.000000e+00> : vector<16xf32>
    %6 = vector.multi_reduction <add>, %5, %cst_5 [1] : vector<16x50xf32> to vector<16xf32>
    %7 = vector.shape_cast %6 : vector<16xf32> to vector<16x1xf32>
    %cst_6 = arith.constant 5.000000e+01 : f32
    %8 = vector.broadcast %cst_6 : f32 to vector<16x1xf32>
    %9 = arith.divf %7, %8 : vector<16x1xf32>
    %10 = vector.broadcast %9 : vector<16x1xf32> to vector<16x50xf32>
    %11 = arith.subf %5, %10 : vector<16x50xf32>
    %12 = arith.mulf %11, %11 : vector<16x50xf32>
    %cst_7 = arith.constant dense<0.000000e+00> : vector<16xf32>
    %13 = vector.multi_reduction <add>, %12, %cst_7 [1] : vector<16x50xf32> to vector<16xf32>
    %14 = vector.shape_cast %13 : vector<16xf32> to vector<16x1xf32>
    %cst_8 = arith.constant 5.000000e+01 : f32
    %15 = vector.broadcast %cst_8 : f32 to vector<16x1xf32>
    %16 = arith.divf %14, %15 : vector<16x1xf32>
    %17 = vector.broadcast %9 : vector<16x1xf32> to vector<16x50xf32>
    %18 = arith.subf %5, %17 : vector<16x50xf32>
    %cst_9 = arith.constant 9.99999974E-6 : f32
    %19 = vector.broadcast %cst_9 : f32 to vector<16x1xf32>
    %20 = arith.addf %16, %19 : vector<16x1xf32>
    %21 = math.rsqrt %20 : vector<16x1xf32>
    %22 = vector.broadcast %21 : vector<16x1xf32> to vector<16x50xf32>
    %23 = arith.mulf %18, %22 : vector<16x50xf32>
    %c0_10 = arith.constant 0 : index
    %c0_11 = arith.constant 0 : index
    %24 = vector.load %arg3[%c0_10, %c0_11] : memref<16x1xf32, #tpu.memory_space<vmem>>, vector<16x1xf32>
    %25 = vector.broadcast %24 : vector<16x1xf32> to vector<16x50xf32>
    %26 = arith.mulf %25, %23 : vector<16x50xf32>
    %c0_12 = arith.constant 0 : index
    %c0_13 = arith.constant 0 : index
    %27 = vector.load %arg4[%c0_12, %c0_13] : memref<16x1xf32, #tpu.memory_space<vmem>>, vector<16x1xf32>
    %28 = vector.broadcast %27 : vector<16x1xf32> to vector<16x50xf32>
    %29 = arith.addf %26, %28 : vector<16x50xf32>
    %30 = arith.negf %29 : vector<16x50xf32>
    %31 = math.exp %30 : vector<16x50xf32>
    %cst_14 = arith.constant 1.000000e+00 : f32
    %32 = vector.broadcast %cst_14 : f32 to vector<16x50xf32>
    %33 = arith.addf %32, %31 : vector<16x50xf32>
    %34 = arith.divf %32, %33 : vector<16x50xf32>
    %c0_15 = arith.constant 0 : index
    %c0_16 = arith.constant 0 : index
    %35 = vector.load %arg5[%c0_15, %c0_16] : memref<16x50xf32, #tpu.memory_space<vmem>>, vector<16x50xf32>
    tpu.vector_store %arg5[%c0_15, %c0_16], %34 {strides = array<i32>} : memref<16x50xf32, #tpu.memory_space<vmem>>, vector<16x50xf32>,
    return
  }
}

module attributes {stable_mosaic.version = 11 : i64} {
  func.func @_mlp_head_kernel(%arg0: memref<2x400xbf16, #tpu.memory_space<vmem>>, %arg1: memref<400x120xbf16, #tpu.memory_space<vmem>>, %arg2: memref<1x120xf32, #tpu.memory_space<vmem>>, %arg3: memref<1x120xf32, #tpu.memory_space<vmem>>, %arg4: memref<1x120xf32, #tpu.memory_space<vmem>>, %arg5: memref<120x84xbf16, #tpu.memory_space<vmem>>, %arg6: memref<1x84xf32, #tpu.memory_space<vmem>>, %arg7: memref<1x84xf32, #tpu.memory_space<vmem>>, %arg8: memref<1x84xf32, #tpu.memory_space<vmem>>, %arg9: memref<84x10xbf16, #tpu.memory_space<vmem>>, %arg10: memref<1x10xf32, #tpu.memory_space<vmem>>, %arg11: memref<2x10xf32, #tpu.memory_space<vmem>>) attributes {dimension_semantics = [], scalar_prefetch = 0 : i64, scratch_operands = 0 : i64, tpu.core_type = #tpu.core_type<tc>} {
    %c0 = arith.constant 0 : index
    %c0_0 = arith.constant 0 : index
    %0 = vector.load %arg0[%c0, %c0_0] : memref<2x400xbf16, #tpu.memory_space<vmem>>, vector<2x400xbf16>
    %c0_1 = arith.constant 0 : index
    %c0_2 = arith.constant 0 : index
    %1 = vector.load %arg1[%c0_1, %c0_2] : memref<400x120xbf16, #tpu.memory_space<vmem>>, vector<400x120xbf16>
    %cst = arith.constant dense<0.000000e+00> : vector<2x120xf32>
    %2 = tpu.matmul %0, %1, %cst {dimension_numbers = #tpu.dot_dimension_numbers<[1], [0], [0], [1], [0, 0, 1, 1], [], []>} : vector<2x400xbf16>, vector<400x120xbf16>, vector<2x120xf32> -> vector<2x120xf32>
    %c0_3 = arith.constant 0 : index
    %c0_4 = arith.constant 0 : index
    %3 = vector.load %arg2[%c0_3, %c0_4] : memref<1x120xf32, #tpu.memory_space<vmem>>, vector<1x120xf32>
    %4 = vector.broadcast %3 : vector<1x120xf32> to vector<2x120xf32>
    %5 = arith.addf %2, %4 : vector<2x120xf32>
    %c0_5 = arith.constant 0 : index
    %c0_6 = arith.constant 0 : index
    %6 = vector.load %arg3[%c0_5, %c0_6] : memref<1x120xf32, #tpu.memory_space<vmem>>, vector<1x120xf32>
    %c0_7 = arith.constant 0 : index
    %c0_8 = arith.constant 0 : index
    %7 = vector.load %arg4[%c0_7, %c0_8] : memref<1x120xf32, #tpu.memory_space<vmem>>, vector<1x120xf32>
    %cst_9 = arith.constant dense<0.000000e+00> : vector<120xf32>
    %8 = vector.multi_reduction <add>, %5, %cst_9 [0] : vector<2x120xf32> to vector<120xf32>
    %9 = vector.shape_cast %8 : vector<120xf32> to vector<1x120xf32>
    %cst_10 = arith.constant 2.000000e+00 : f32
    %10 = vector.broadcast %cst_10 : f32 to vector<1x120xf32>
    %11 = arith.divf %9, %10 : vector<1x120xf32>
    %12 = vector.broadcast %11 : vector<1x120xf32> to vector<2x120xf32>
    %13 = arith.subf %5, %12 : vector<2x120xf32>
    %14 = arith.mulf %13, %13 : vector<2x120xf32>
    %cst_11 = arith.constant dense<0.000000e+00> : vector<120xf32>
    %15 = vector.multi_reduction <add>, %14, %cst_11 [0] : vector<2x120xf32> to vector<120xf32>
    %16 = vector.shape_cast %15 : vector<120xf32> to vector<1x120xf32>
    %cst_12 = arith.constant 2.000000e+00 : f32
    %17 = vector.broadcast %cst_12 : f32 to vector<1x120xf32>
    %18 = arith.divf %16, %17 : vector<1x120xf32>
    %19 = vector.broadcast %11 : vector<1x120xf32> to vector<2x120xf32>
    %20 = arith.subf %5, %19 : vector<2x120xf32>
    %21 = vector.broadcast %6 : vector<1x120xf32> to vector<2x120xf32>
    %22 = arith.mulf %21, %20 : vector<2x120xf32>
    %cst_13 = arith.constant 9.99999974E-6 : f32
    %23 = vector.broadcast %cst_13 : f32 to vector<1x120xf32>
    %24 = arith.addf %18, %23 : vector<1x120xf32>
    %25 = math.rsqrt %24 : vector<1x120xf32>
    %26 = vector.broadcast %25 : vector<1x120xf32> to vector<2x120xf32>
    %27 = arith.mulf %22, %26 : vector<2x120xf32>
    %28 = vector.broadcast %7 : vector<1x120xf32> to vector<2x120xf32>
    %29 = arith.addf %27, %28 : vector<2x120xf32>
    %30 = arith.negf %29 : vector<2x120xf32>
    %31 = math.exp %30 : vector<2x120xf32>
    %cst_14 = arith.constant 1.000000e+00 : f32
    %32 = vector.broadcast %cst_14 : f32 to vector<2x120xf32>
    %33 = arith.addf %32, %31 : vector<2x120xf32>
    %34 = arith.divf %32, %33 : vector<2x120xf32>
    %35 = arith.truncf %34 : vector<2x120xf32> to vector<2x120xbf16>
    %c0_15 = arith.constant 0 : index
    %c0_16 = arith.constant 0 : index
    %36 = vector.load %arg5[%c0_15, %c0_16] : memref<120x84xbf16, #tpu.memory_space<vmem>>, vector<120x84xbf16>
    %cst_17 = arith.constant dense<0.000000e+00> : vector<2x84xf32>
    %37 = tpu.matmul %35, %36, %cst_17 {dimension_numbers = #tpu.dot_dimension_numbers<[1], [0], [0], [1], [0, 0, 1, 1], [], []>} : vector<2x120xbf16>, vector<120x84xbf16>, vector<2x84xf32> -> vector<2x84xf32>
    %c0_18 = arith.constant 0 : index
    %c0_19 = arith.constant 0 : index
    %38 = vector.load %arg6[%c0_18, %c0_19] : memref<1x84xf32, #tpu.memory_space<vmem>>, vector<1x84xf32>
    %39 = vector.broadcast %38 : vector<1x84xf32> to vector<2x84xf32>
    %40 = arith.addf %37, %39 : vector<2x84xf32>
    %c0_20 = arith.constant 0 : index
    %c0_21 = arith.constant 0 : index
    %41 = vector.load %arg7[%c0_20, %c0_21] : memref<1x84xf32, #tpu.memory_space<vmem>>, vector<1x84xf32>
    %c0_22 = arith.constant 0 : index
    %c0_23 = arith.constant 0 : index
    %42 = vector.load %arg8[%c0_22, %c0_23] : memref<1x84xf32, #tpu.memory_space<vmem>>, vector<1x84xf32>
    %cst_24 = arith.constant dense<0.000000e+00> : vector<84xf32>
    %43 = vector.multi_reduction <add>, %40, %cst_24 [0] : vector<2x84xf32> to vector<84xf32>
    %44 = vector.shape_cast %43 : vector<84xf32> to vector<1x84xf32>
    %cst_25 = arith.constant 2.000000e+00 : f32
    %45 = vector.broadcast %cst_25 : f32 to vector<1x84xf32>
    %46 = arith.divf %44, %45 : vector<1x84xf32>
    %47 = vector.broadcast %46 : vector<1x84xf32> to vector<2x84xf32>
    %48 = arith.subf %40, %47 : vector<2x84xf32>
    %49 = arith.mulf %48, %48 : vector<2x84xf32>
    %cst_26 = arith.constant dense<0.000000e+00> : vector<84xf32>
    %50 = vector.multi_reduction <add>, %49, %cst_26 [0] : vector<2x84xf32> to vector<84xf32>
    %51 = vector.shape_cast %50 : vector<84xf32> to vector<1x84xf32>
    %cst_27 = arith.constant 2.000000e+00 : f32
    %52 = vector.broadcast %cst_27 : f32 to vector<1x84xf32>
    %53 = arith.divf %51, %52 : vector<1x84xf32>
    %54 = vector.broadcast %46 : vector<1x84xf32> to vector<2x84xf32>
    %55 = arith.subf %40, %54 : vector<2x84xf32>
    %56 = vector.broadcast %41 : vector<1x84xf32> to vector<2x84xf32>
    %57 = arith.mulf %56, %55 : vector<2x84xf32>
    %cst_28 = arith.constant 9.99999974E-6 : f32
    %58 = vector.broadcast %cst_28 : f32 to vector<1x84xf32>
    %59 = arith.addf %53, %58 : vector<1x84xf32>
    %60 = math.rsqrt %59 : vector<1x84xf32>
    %61 = vector.broadcast %60 : vector<1x84xf32> to vector<2x84xf32>
    %62 = arith.mulf %57, %61 : vector<2x84xf32>
    %63 = vector.broadcast %42 : vector<1x84xf32> to vector<2x84xf32>
    %64 = arith.addf %62, %63 : vector<2x84xf32>
    %65 = arith.negf %64 : vector<2x84xf32>
    %66 = math.exp %65 : vector<2x84xf32>
    %cst_29 = arith.constant 1.000000e+00 : f32
    %67 = vector.broadcast %cst_29 : f32 to vector<2x84xf32>
    %68 = arith.addf %67, %66 : vector<2x84xf32>
    %69 = arith.divf %67, %68 : vector<2x84xf32>
    %70 = arith.truncf %69 : vector<2x84xf32> to vector<2x84xbf16>
    %c0_30 = arith.constant 0 : index
    %c0_31 = arith.constant 0 : index
    %71 = vector.load %arg9[%c0_30, %c0_31] : memref<84x10xbf16, #tpu.memory_space<vmem>>, vector<84x10xbf16>
    %cst_32 = arith.constant dense<0.000000e+00> : vector<2x10xf32>
    %72 = tpu.matmul %70, %71, %cst_32 {dimension_numbers = #tpu.dot_dimension_numbers<[1], [0], [0], [1], [0, 0, 1, 1], [], []>} : vector<2x84xbf16>, vector<84x10xbf16>, vector<2x10xf32> -> vector<2x10xf32>
    %c0_33 = arith.constant 0 : index
    %c0_34 = arith.constant 0 : index
    %73 = vector.load %arg10[%c0_33, %c0_34] : memref<1x10xf32, #tpu.memory_space<vmem>>, vector<1x10xf32>
    %74 = vector.broadcast %73 : vector<1x10xf32> to vector<2x10xf32>
    %75 = arith.addf %72, %74 : vector<2x10xf32>
    %cst_35 = arith.constant dense<0xFF800000> : vector<2xf32>
    %76 = vector.multi_reduction <maximumf>, %75, %cst_35 [1] : vector<2x10xf32> to vector<2xf32>
    %77 = vector.shape_cast %76 : vector<2xf32> to vector<2x1xf32>
    %78 = vector.broadcast %77 : vector<2x1xf32> to vector<2x10xf32>
    %79 = arith.subf %75, %78 : vector<2x10xf32>
    %80 = math.exp %79 : vector<2x10xf32>
    %cst_36 = arith.constant dense<0.000000e+00> : vector<2xf32>
    %81 = vector.multi_reduction <add>, %80, %cst_36 [1] : vector<2x10xf32> to vector<2xf32>
    %82 = vector.shape_cast %81 : vector<2xf32> to vector<2x1xf32>
    %83 = vector.broadcast %82 : vector<2x1xf32> to vector<2x10xf32>
    %84 = arith.divf %80, %83 : vector<2x10xf32>
    %c0_37 = arith.constant 0 : index
    %c0_38 = arith.constant 0 : index
    %85 = vector.load %arg11[%c0_37, %c0_38] : memref<2x10xf32, #tpu.memory_space<vmem>>, vector<2x10xf32>
    tpu.vector_store %arg11[%c0_37, %c0_38], %84 {strides = array<i32>} : memref<2x10xf32, #tpu.memory_space<vmem>>, vector<2x10xf32>,
    return
  }
}

</mosaic_0001>

<bundles_post_ra>
// kernel: lenet_bn_forward.3
= control target key start
LH: loop header
LB: loop body
LE: loop exit
PB: predicated region body
PF: predicated region fallthrough
CT: control target
= control target key end

     0   :  { %v469_v1 = vmov 0   ;;  %vm188_vm0 = vcmask 1041408   ;;  %vm184_vm1 = vcmask 818176   ;;  %vm283_vm2 = vcmask 1045504   ;;  %s611_s0 = inlined_call_operand.vmem [shape: bf16[100,392], index: 0, kind: input, shape index: {}]   ;;  %s612_s2 = inlined_call_operand.vmem [shape: f32[6,1], index: 2, kind: input, shape index: {}]   ;;  %s613_s1 = inlined_call_operand.vmem [shape: bf16[6,100], index: 1, kind: input, shape index: {}]   ;;  %s614_s3 = inlined_call_operand.vmem [shape: f32[6,1], index: 3, kind: input, shape index: {}]   ;;  %s615_s4 = inlined_call_operand.vmem [shape: f32[6,1], index: 4, kind: input, shape index: {}]   ;;  %s616_s5 = inlined_call_operand.vmem [shape: f32[6,392], index: 5, kind: output, shape index: {}]  }
   0x1   :  { %v411_v0 = vld [vmem:[%s611_s0 + $0x4] ss:$16 sps:$4 sm:$0xff]   ;;  %233 = vmatprep.mubr.bf16.mxu0 %v469_v1  ;;  %274 = vmatprep.mubr.bf16.mxu1 %v469_v1  ;;  %v413_v2 = vld [vmem:[%s611_s0 + $0xc] ss:$16 sps:$4 sm:$0xff]   ;;  %v415_v3 = vld [vmem:[%s611_s0] ss:$16 sps:$4 sm:$0xff]  }
   0x2   :  { %409 = vset.pattern.permute.xlu0 %v469_v1  ;;  %410 = vset.pattern.permute.xlu1 %v469_v1  ;;  %v416_v4 = vld [vmem:[%s611_s0 + $0x8] ss:$16 sps:$4 sm:$0xff]   ;;  %v417_v5 = vld [vmem:[%s611_s0 + $0x24] ss:$16 sps:$4 sm:$0xff]   ;;  %v419_v6 = vld [vmem:[%s611_s0 + $0x2c] ss:$16 sps:$4 sm:$0xff]  }
   0x3   :  { %201 = vmatprep.subr.bf16.mxu0 %v411_v0  ;;  %242 = vmatprep.subr.bf16.mxu1 %v413_v2  ;;  %v421_v7 = vld [vmem:[%s611_s0 + $0x20] ss:$16 sps:$4 sm:$0xff]   ;;  %v422_v8 = vld [vmem:[%s611_s0 + $0x28] ss:$16 sps:$4 sm:$0xff]   ;;  %v423_v9 = vld [vmem:[%s611_s0 + $0x44] ss:$16 sps:$4 sm:$0xff]  }
   0x4   :  { %202 = vmatpush1.bf16.msra.mxu0 %v415_v3  ;;  %243 = vmatpush1.bf16.msra.mxu1 %v416_v4  ;;  %v425_v10 = vld [vmem:[%s611_s0 + $0x4c] ss:$16 sps:$4 sm:$0xff]   ;;  %v427_v11 = vld [vmem:[%s611_s0 + $0x40] ss:$16 sps:$4 sm:$0xff]   ;;  %v428_v12 = vld [vmem:[%s611_s0 + $0x48] ss:$16 sps:$4 sm:$0xff]  }
   0x5   :  { %203 = vmatprep.subr.bf16.mxu0 %v417_v5  ;;  %244 = vmatprep.subr.bf16.mxu1 %v419_v6  ;;  %v429_v13 = vld [vmem:[%s611_s0 + $0x64] ss:$16 sps:$4 sm:$0xff]   ;;  %v431_v14 = vld [vmem:[%s611_s0 + $0x6c] ss:$16 sps:$4 sm:$0xff]   ;;  %v433_v15 = vld [vmem:[%s611_s0 + $0x60] ss:$16 sps:$4 sm:$0xff]  }
   0x6   :  { %v434_v16 = vld [vmem:[%s611_s0 + $0x68] ss:$16 sps:$4 sm:$0xff]   ;;  %v435_v17 = vld [vmem:[%s611_s0 + $0x84] ss:$16 sps:$4 sm:$0xff]   ;;  %v437_v18 = vld [vmem:[%s611_s0 + $0x8c] ss:$16 sps:$4 sm:$0xff]  }
   0x7   :  { %v439_v19 = vld [vmem:[%s611_s0 + $0x80] ss:$16 sps:$4 sm:$0xff]   ;;  %v440_v20 = vld [vmem:[%s611_s0 + $0x88] ss:$16 sps:$4 sm:$0xff]   ;;  %v441_v21 = vld [vmem:[%s611_s0 + $0xa4] ss:$16 sps:$4 sm:$0xff]  }
   0x8   :  { %204 = vmatpush1.bf16.msra.mxu0 %v421_v7  ;;  %245 = vmatpush1.bf16.msra.mxu1 %v422_v8  ;;  %v443_v22 = vld [vmem:[%s611_s0 + $0xac] ss:$16 sps:$4 sm:$0xff]   ;;  %v46_v23 = vld [vmem:[%s611_s0 + $0xc0] sm:$0x33]  ;;  %v446_v27 = vld [vmem:[%s611_s0 + $0xa8] ss:$16 sps:$4 sm:$0xff]  }
   0x9   :  { %205 = vmatprep.subr.bf16.mxu0 %v423_v9  ;;  %246 = vmatprep.subr.bf16.mxu1 %v425_v10  ;;  %v48_v24 = vld [vmem:[%s612_s2] sm:$0x3f]  ;;  %v47_v25 = vld [vmem:[%s611_s0 + $0xc8] sm:$0x33]  ;;  %v397_v28 = vcombine.high %v46_v23, %v46_v23  ;;  %v396_v30 = vcombine.low %v46_v23, %v46_v23  ;;  %vm289_vm3 = vcmask 62464  }
   0xa   :  { %51 = vperm.xlu0 %409, %v48_v24   ;;  %v445_v26 = vld [vmem:[%s611_s0 + $0xa0] ss:$16 sps:$4 sm:$0xff]   ;;  %v399_v29 = vcombine.high %v47_v25, %v47_v25  ;;  %v398_v31 = vcombine.low %v47_v25, %v47_v25 }
   0xb   :  { %v190_v32 = vsel %vm188_vm0, %v396_v30, 0  ;;  %v21_v34 = vld [vmem:[%s613_s1] sm:$0x7] }
   0xc   :  { %206 = vmatpush1.bf16.msra.mxu0 %v427_v11  ;;  %247 = vmatpush1.bf16.msra.mxu1 %v428_v12  ;;  %v196_v33 = vsel %vm188_vm0, %v398_v31, 0  ;;  %v320_v35 = vld [vmem:[%s614_s3] sm:$0x3f] }
   0xd   :  { %207 = vmatprep.subr.bf16.mxu0 %v429_v13  ;;  %248 = vmatprep.subr.bf16.mxu1 %v431_v14  ;;  %v330_v9 = vld [vmem:[%s615_s4] sm:$0x3f] }
   0xe   :  { %323 = vperm.xlu1 %410, %v320_v35  }
  0x10   :  { %208 = vmatpush1.bf16.msra.mxu0 %v433_v15  ;;  %249 = vmatpush1.bf16.msra.mxu1 %v434_v16 }
  0x11   :  { %209 = vmatprep.subr.bf16.mxu0 %v435_v17  ;;  %250 = vmatprep.subr.bf16.mxu1 %v437_v18 }
  0x14   :  { %210 = vmatpush1.bf16.msra.mxu0 %v439_v19  ;;  %251 = vmatpush1.bf16.msra.mxu1 %v440_v20 }
  0x15   :  { %211 = vmatprep.subr.bf16.mxu0 %v441_v21  ;;  %252 = vmatprep.subr.bf16.mxu1 %v443_v22 }
  0x18   :  { %212 = vmatpush1.bf16.msra.mxu0 %v445_v26  ;;  %253 = vmatpush1.bf16.msra.mxu1 %v446_v27 }
  0x19   :  { %400 = vmatprep.subr.msk.bf16.mxu0 %vm188_vm0, %v397_v28  ;;  %402 = vmatprep.subr.msk.bf16.mxu1 %vm188_vm0, %v399_v29 }
  0x1c   :  { %214 = vmatpush1.bf16.msra.mxu0 %v190_v32  ;;  %255 = vmatpush1.bf16.msra.mxu1 %v196_v33 }
  0x1f   :  { %401 = vmatmul.mubr.msk.bf16.vlgmr.msra.gmra.mrb[0].mxu0 %vm184_vm1, %v21_v34  ;;  %403 = vmatmul.mubr.msk.bf16.vlgmr.msra.gmra.mrb[0].mxu1 %vm184_vm1, %v21_v34 }
  0x89   :  { %v52_v36 = vpop.permute.xlu0 %51 }
  0x8d   :  { %v324_v10 = vpop.permute.xlu1 %323 }
  0xf2   :  { %v235_v37 = vpop.f32.mrb[0].mxu0  ;;  %v276_v38 = vpop.f32.mrb[0].mxu1 }
  0xf3   :  { %v236_v39 = vadd.f32 %v235_v37, %v52_v36  ;;  %v237_v40 = vpop.f32.mrb[1].mxu0  ;;  %v278_v41 = vpop.f32.mrb[1].mxu1  ;;  %v277_v42 = vadd.f32 %v276_v38, %v52_v36 }
  0xf4   :  { %v238_v43 = vadd.f32 %v237_v40, %v52_v36  ;;  %v239_v44 = vpop.f32.mrb[2].mxu0  ;;  %v280_v45 = vpop.f32.mrb[2].mxu1  ;;  %v279_v50 = vadd.f32 %v278_v41, %v52_v36 }
  0xf5   :  { %v284_v46 = vsel %vm283_vm2, %v236_v39, 0.0  ;;  %v240_v47 = vpop.f32.mrb[3].mxu0  ;;  %v281_v48 = vpop.f32.mrb[3].mxu1  ;;  %v287_v52 = vsel %vm283_vm2, %v277_v42, 0.0 }
  0xf6   :  { %v285_v49 = vsel %vm283_vm2, %v238_v43, 0.0  ;;  %v290_v54 = vsel %vm289_vm3, %v279_v50, 0.0 }
  0xf7   :  { %v286_v51 = vadd.f32 %v285_v49, %v284_v46 }
  0xf9   :  { %v288_v53 = vadd.f32 %v287_v52, %v286_v51 }
  0xfb   :  { %v291_v55 = vadd.f32 %v290_v54, %v288_v53 }
  0xfd   :  { %292 = vadd.xlane.f32.xlu0 %v291_v55 }
 0x18a   :  { %v293_v56 = vpop.xlane.xlu0 %292 }
 0x18b   :  { %v295_v57 = vmul.f32 0.0025510204, %v293_v56 }
 0x18d   :  { %v296_v58 = vsub.f32 %v236_v39, %v295_v57  ;;  %v297_v59 = vsub.f32 %v238_v43, %v295_v57  ;;  %v298_v60 = vsub.f32 %v277_v42, %v295_v57  ;;  %v299_v61 = vsub.f32 %v279_v50, %v295_v57 }
 0x18f   :  { %v300_v62 = vmul.f32 %v296_v58, %v296_v58  ;;  %v301_v63 = vmul.f32 %v297_v59, %v297_v59  ;;  %v302_v0 = vmul.f32 %v298_v60, %v298_v60  ;;  %v303_v1 = vmul.f32 %v299_v61, %v299_v61 }
 0x191   :  { %v304_v2 = vsel %vm283_vm2, %v300_v62, 0.0  ;;  %v305_v3 = vsel %vm283_vm2, %v301_v63, 0.0  ;;  %v307_v5 = vsel %vm283_vm2, %v302_v0, 0.0  ;;  %v309_v7 = vsel %vm289_vm3, %v303_v1, 0.0 }
 0x192   :  { %v306_v4 = vadd.f32 %v305_v3, %v304_v2 }
 0x194   :  { %v308_v6 = vadd.f32 %v307_v5, %v306_v4 }
 0x196   :  { %v310_v8 = vadd.f32 %v309_v7, %v308_v6 }
 0x198   :  { %311 = vadd.xlane.f32.xlu1 %v310_v8 }
 0x1a9   :  { %333 = vperm.xlu1 %410, %v330_v9  }
 0x225   :  { %v312_v11 = vpop.xlane.xlu1 %311 }
 0x226   :  { %v313_v12 = vmul.f32 0.0025510204, %v312_v11 }
 0x228   :  { %v314_v13 = vadd.f32 1e-05, %v313_v12 }
 0x229   :  { %v334_v23 = vpop.permute.xlu1 %333 }
 0x22a   :  { %451 = vrsqrt.f32 %v314_v13 }
 0x234   :  { %v452_v14 = vpop.eup %451 }
 0x235   :  { %v316_v15 = vmul.f32 %v452_v14, %v296_v58  ;;  %v317_v16 = vmul.f32 %v452_v14, %v297_v59  ;;  %v318_v17 = vmul.f32 %v452_v14, %v298_v60  ;;  %v319_v18 = vmul.f32 %v452_v14, %v299_v61 }
 0x237   :  { %v326_v19 = vmul.f32 %v324_v10, %v316_v15  ;;  %v327_v20 = vmul.f32 %v324_v10, %v317_v16  ;;  %v328_v21 = vmul.f32 %v324_v10, %v318_v17  ;;  %v329_v22 = vmul.f32 %v324_v10, %v319_v18 }
 0x239   :  { %v336_v24 = vadd.f32 %v334_v23, %v326_v19  ;;  %v337_v25 = vadd.f32 %v334_v23, %v327_v20  ;;  %v338_v26 = vadd.f32 %v334_v23, %v328_v21  ;;  %v339_v27 = vadd.f32 %v334_v23, %v329_v22 }
 0x23b   :  { %v404_v28 = vmul.f32 -1.442695, %v336_v24  ;;  %v405_v29 = vmul.f32 -1.442695, %v337_v25  ;;  %v406_v30 = vmul.f32 -1.442695, %v338_v26 }
 0x23c   :  { %v407_v31 = vmul.f32 -1.442695, %v339_v27 }
 0x23d   :  { %453 = vpow2.f32 %v404_v28 }
 0x23e   :  { %455 = vpow2.f32 %v405_v29 }
 0x23f   :  { %457 = vpow2.f32 %v406_v30 }
 0x240   :  { %459 = vpow2.f32 %v407_v31 }
 0x247   :  { %v454_v32 = vpop.eup %453 }
 0x248   :  { %v456_v33 = vpop.eup %455  ;;  %v352_v34 = vadd.f32 1.0, %v454_v32 }
 0x249   :  { %v458_v35 = vpop.eup %457  ;;  %v353_v36 = vadd.f32 1.0, %v456_v33 }
 0x24a   :  { %v460_v37 = vpop.eup %459  ;;  %v354_v38 = vadd.f32 1.0, %v458_v35  ;;  %461 = vrcp.f32 %v352_v34 }
 0x24b   :  { %v355_v39 = vadd.f32 1.0, %v460_v37  ;;  %463 = vrcp.f32 %v353_v36 }
 0x24c   :  { %465 = vrcp.f32 %v354_v38 }
 0x24d   :  { %467 = vrcp.f32 %v355_v39 }
 0x254   :  { %v462_v40 = vpop.eup %461 }
 0x255   :  { %v464_v41 = vpop.eup %463  ;;  %364 = vst [vmem:[%s616_s5] sm:$0x3f] %v462_v40 }
 0x256   :  { %v466_v42 = vpop.eup %465  ;;  %365 = vst [vmem:[%s616_s5 + $0x8] sm:$0x3f] %v464_v41 }
 0x257   :  { %v468_v43 = vpop.eup %467  ;;  %366 = vst [vmem:[%s616_s5 + $0x10] sm:$0x3f] %v466_v42 }
 0x258   :  { %367 = vst.msk [vmem:[%s616_s5 + $0x18] sm:$0x3f] %vm289_vm3, %v468_v43 }

// kernel: lenet_bn_forward.4
= control target key start
LH: loop header
LB: loop body
LE: loop exit
PB: predicated region body
PF: predicated region fallthrough
CT: control target
= control target key end

     0   :  { %v744_v2 = vmov 0   ;;  %v745_v34 = vmov 0.0   ;;  %vm746_vm0 = vmmov 0   ;;  %vm368_vm1 = vcmask 1043456   ;;  %s936_s0 = inlined_call_operand.vmem [shape: bf16[600,50], index: 0, kind: input, shape index: {}]   ;;  %s937_s1 = inlined_call_operand.vmem [shape: bf16[16,600], index: 1, kind: input, shape index: {}]   ;;  %s938_s2 = inlined_call_operand.vmem [shape: f32[16,1], index: 2, kind: input, shape index: {}]   ;;  %s939_s3 = inlined_call_operand.vmem [shape: f32[16,1], index: 3, kind: input, shape index: {}]   ;;  %s940_s4 = inlined_call_operand.vmem [shape: f32[16,1], index: 4, kind: input, shape index: {}]   ;;  %s941_s5 = inlined_call_operand.vmem [shape: f32[16,50], index: 5, kind: output, shape index: {}]  }
   0x1   :  { %v687_v0 = vld [vmem:[%s936_s0 + $0x40] sm:$0xff]   ;;  %685 = vset.pattern.permute.xlu0 %v744_v2  ;;  %686 = vset.pattern.permute.xlu1 %v744_v2  ;;  %v691_v5 = vld [vmem:[%s936_s0 + $0x48] sm:$0xff]   ;;  %v695_v9 = vld [vmem:[%s936_s0 + $0x50] sm:$0xff]   ;;  %vm364_vm2 = vcmask 719872   ;;  %vm495_vm3 = vcmask 408576  }
   0x2   :  { %v688_v1 = vld [vmem:[%s936_s0] sm:$0xff]   ;;  %615 = vmatprep.subr.bf16.mxu0 %v687_v0  ;;  %v692_v6 = vld [vmem:[%s936_s0 + $0x8] sm:$0xff]   ;;  %v696_v10 = vld [vmem:[%s936_s0 + $0x10] sm:$0xff]  }
   0x3   :  { %v689_v3 = vld [vmem:[%s936_s0 + $0xc0] sm:$0xff]   ;;  %616 = vmatpush3.bf16.msra.mxu0 %v688_v1  ;;  %v693_v7 = vld [vmem:[%s936_s0 + $0xc8] sm:$0xff]   ;;  %v697_v11 = vld [vmem:[%s936_s0 + $0xd0] sm:$0xff]  }
   0x4   :  { %v690_v4 = vld [vmem:[%s936_s0 + $0x80] sm:$0xff]   ;;  %637 = vmatprep.subr.bf16.mxu1 %v689_v3  ;;  %617 = vmatprep.subr.bf16.mxu0 %v691_v5  ;;  %v694_v8 = vld [vmem:[%s936_s0 + $0x88] sm:$0xff]   ;;  %v698_v12 = vld [vmem:[%s936_s0 + $0x90] sm:$0xff]  }
   0x5   :  { %638 = vmatpush3.bf16.msra.mxu1 %v690_v4  ;;  %v699_v13 = vld [vmem:[%s936_s0 + $0x58] sm:$0xff]   ;;  %v703_v17 = vld [vmem:[%s936_s0 + $0x60] sm:$0xff]   ;;  %v707_v21 = vld [vmem:[%s936_s0 + $0x68] sm:$0xff]  }
   0x6   :  { %639 = vmatprep.subr.bf16.mxu1 %v693_v7  ;;  %v700_v14 = vld [vmem:[%s936_s0 + $0x18] sm:$0xff]   ;;  %v704_v18 = vld [vmem:[%s936_s0 + $0x20] sm:$0xff]   ;;  %v708_v22 = vld [vmem:[%s936_s0 + $0x28] sm:$0xff]  }
   0x7   :  { %618 = vmatpush3.bf16.msra.mxu0 %v692_v6  ;;  %v701_v15 = vld [vmem:[%s936_s0 + $0xd8] sm:$0xff]   ;;  %v705_v19 = vld [vmem:[%s936_s0 + $0xe0] sm:$0xff]   ;;  %v709_v23 = vld [vmem:[%s936_s0 + $0xe8] sm:$0xff]  }
   0x8   :  { %619 = vmatprep.subr.bf16.mxu0 %v695_v9  ;;  %v702_v16 = vld [vmem:[%s936_s0 + $0x98] sm:$0xff]   ;;  %v706_v20 = vld [vmem:[%s936_s0 + $0xa0] sm:$0xff]   ;;  %v710_v24 = vld [vmem:[%s936_s0 + $0xa8] sm:$0xff]  }
   0x9   :  { %640 = vmatpush3.bf16.msra.mxu1 %v694_v8  ;;  %v711_v25 = vld [vmem:[%s936_s0 + $0x70] sm:$0xff]   ;;  %v715_v29 = vld [vmem:[%s936_s0 + $0x78] sm:$0xff]   ;;  %v724_v37 = vld [vmem:[%s937_s1 + $0xc] ss:$20 sps:$4 sm:$0xff]  }
   0xa   :  { %641 = vmatprep.subr.bf16.mxu1 %v697_v11  ;;  %v712_v26 = vld [vmem:[%s936_s0 + $0x30] sm:$0xff]   ;;  %v716_v30 = vld [vmem:[%s936_s0 + $0x38] sm:$0xff]   ;;  %v725_v38 = vld [vmem:[%s936_s0 + $0x100] sm:$0xff]   ;;  %445 = vmatprep.mubr.bf16.mxu1 %v724_v37 }
   0xb   :  { %620 = vmatpush3.bf16.msra.mxu0 %v696_v10  ;;  %v713_v27 = vld [vmem:[%s936_s0 + $0xf0] sm:$0xff]   ;;  %v717_v31 = vld [vmem:[%s936_s0 + $0xf8] sm:$0xff]   ;;  %v726_v39 = vld [vmem:[%s936_s0 + $0x108] sm:$0xff]  }
   0xc   :  { %621 = vmatprep.subr.bf16.mxu0 %v699_v13  ;;  %v714_v28 = vld [vmem:[%s936_s0 + $0xb0] sm:$0xff]   ;;  %v720_v33 = vld [vmem:[%s937_s1 + $0x4] ss:$20 sps:$4 sm:$0xff]   ;;  %v722_v36 = vld [vmem:[%s937_s1 + $0x8] ss:$20 sps:$4 sm:$0xff]  }
   0xd   :  { %642 = vmatpush3.bf16.msra.mxu1 %v698_v12  ;;  %v718_v32 = vld [vmem:[%s937_s1] ss:$20 sps:$4 sm:$0xff]   ;;  %v721_v35 = vld [vmem:[%s936_s0 + $0xb8] sm:$0xff]   ;;  %404 = vmatprep.mubr.bf16.mxu0 %v720_v33  ;;  %v103_v42 = vld [vmem:[%s938_s2 + $0x8] sm:$0xff] }
   0xe   :  { %643 = vmatprep.subr.bf16.mxu1 %v701_v15  ;;  %v727_v40 = vld [vmem:[%s936_s0 + $0x110] sm:$0xff]   ;;  %v102_v41 = vld [vmem:[%s938_s2] sm:$0xff]  ;;  %v728_v43 = vld [vmem:[%s936_s0 + $0x118] sm:$0xff]  }
   0xf   :  { %622 = vmatpush3.bf16.msra.mxu0 %v700_v14  ;;  %106 = vperm.xlu0 %685, %v102_v41   ;;  %v729_v44 = vld [vmem:[%s936_s0 + $0x120] sm:$0xff]   ;;  %v730_v45 = vld [vmem:[%s936_s0 + $0x128] ss:$0 sps:$4 sm:$0xff]  }
  0x10   :  { %623 = vmatprep.subr.bf16.mxu0 %v703_v17  ;;  %v370_v46 = vsel %vm368_vm1, %v730_v45, 0  ;;  %v731_v47 = vld [vmem:[%s937_s1 + $0x10] ss:$20 sps:$4 sm:$0xff]   ;;  %v524_v11 = vld [vmem:[%s939_s3 + $0x8] sm:$0xff] }
  0x11   :  { %644 = vmatpush3.bf16.msra.mxu1 %v702_v16  ;;  %v523_v10 = vld [vmem:[%s939_s3] sm:$0xff] }
  0x12   :  { %645 = vmatprep.subr.bf16.mxu1 %v705_v19  ;;  %v537_v12 = vld [vmem:[%s940_s4] sm:$0xff] }
  0x13   :  { %624 = vmatpush3.bf16.msra.mxu0 %v704_v18  ;;  %111 = vperm.xlu0 %685, %v103_v42  }
  0x14   :  { %625 = vmatprep.subr.bf16.mxu0 %v707_v21 }
  0x15   :  { %646 = vmatpush3.bf16.msra.mxu1 %v706_v20 }
  0x16   :  { %647 = vmatprep.subr.bf16.mxu1 %v709_v23  ;;  %v538_v23 = vld [vmem:[%s940_s4 + $0x8] sm:$0xff] }
  0x17   :  { %626 = vmatpush3.bf16.msra.mxu0 %v708_v22 }
  0x18   :  { %627 = vmatprep.subr.bf16.mxu0 %v711_v25 }
  0x19   :  { %648 = vmatpush3.bf16.msra.mxu1 %v710_v24 }
  0x1a   :  { %649 = vmatprep.subr.bf16.mxu1 %v713_v27 }
  0x1b   :  { %628 = vmatpush3.bf16.msra.mxu0 %v712_v26 }
  0x1c   :  { %629 = vmatprep.subr.bf16.mxu0 %v715_v29 }
  0x1d   :  { %650 = vmatpush3.bf16.msra.mxu1 %v714_v28 }
  0x1e   :  { %651 = vmatprep.subr.bf16.mxu1 %v717_v31 }
  0x1f   :  { %630 = vmatpush3.bf16.msra.mxu0 %v716_v30 }
  0x20   :  { %666 = vmatprep.subr.bf16.mxu0 %v745_v34 }
  0x21   :  { %652 = vmatpush3.bf16.msra.mxu1 %v721_v35 }
  0x22   :  { %405 = vmatmul.mubr.bf16.vlgmr.msra.gmra.mrb[0].mxu0 %v718_v32 }
  0x23   :  { %678 = vmatprep.mubr.msk.bf16.mxu0 %vm746_vm0, %v745_v34  ;;  %667 = vmatpush3.bf16.msra.mxu0 %v725_v38 }
  0x24   :  { %446 = vmatmul.mubr.bf16.vlgmr.msra.gmra.mrb[0].mxu1 %v722_v36  ;;  %668 = vmatprep.subr.bf16.mxu0 %v745_v34 }
  0x27   :  { %669 = vmatpush3.bf16.msra.mxu0 %v726_v39 }
  0x28   :  { %670 = vmatprep.subr.bf16.mxu0 %v745_v34 }
  0x2b   :  { %671 = vmatpush3.bf16.msra.mxu0 %v727_v40 }
  0x2c   :  { %672 = vmatprep.subr.bf16.mxu0 %v745_v34 }
  0x2f   :  { %673 = vmatpush3.bf16.msra.mxu0 %v728_v43 }
  0x30   :  { %674 = vmatprep.subr.bf16.mxu0 %v745_v34 }
  0x33   :  { %675 = vmatpush3.bf16.msra.mxu0 %v729_v44 }
  0x34   :  { %676 = vmatprep.subr.bf16.mxu0 %v745_v34 }
  0x37   :  { %677 = vmatpush3.bf16.msra.mxu0 %v370_v46 }
  0x3a   :  { %679 = vmatmul.mubr.msk.bf16.vlgmr.msra.gmra.mrb[4].mxu0 %vm364_vm2, %v731_v47 }
  0x8e   :  { %v107_v48 = vpop.permute.xlu0 %106 }
  0x92   :  { %v112_v53 = vpop.permute.xlu0 %111 }
  0xf5   :  { %v631_v49 = vpop.f32.mrb[0].mxu0 }
  0xf6   :  { %v632_v50 = vpop.f32.mrb[1].mxu0 }
  0xf7   :  { %v633_v51 = vadd.f32 %v632_v50, %v631_v49  ;;  %v634_v52 = vpop.f32.mrb[2].mxu0  ;;  %v653_v54 = vpop.f32.mrb[0].mxu1 }
  0xf8   :  { %v635_v55 = vpop.f32.mrb[3].mxu0  ;;  %v654_v58 = vpop.f32.mrb[1].mxu1 }
  0xf9   :  { %v407_v56 = vadd.f32 %v633_v51, %v107_v48  ;;  %v636_v57 = vadd.f32 %v635_v55, %v634_v52  ;;  %v655_v59 = vadd.f32 %v654_v58, %v653_v54  ;;  %v656_v60 = vpop.f32.mrb[2].mxu1 }
  0xfa   :  { %v657_v62 = vpop.f32.mrb[3].mxu1 }
  0xfb   :  { %v410_v61 = vadd.f32 %v636_v57, %v112_v53  ;;  %v658_v63 = vadd.f32 %v657_v62, %v656_v60  ;;  %v448_v0 = vadd.f32 %v655_v59, %v407_v56 }
  0xfd   :  { %v451_v1 = vadd.f32 %v658_v63, %v410_v61 }
 0x10d   :  { %v488_v2 = vpop.f32.mrb[4].mxu0 }
 0x10e   :  { %v489_v3 = vadd.f32 %v488_v2, %v448_v0  ;;  %v680_v4 = vpop.f32.mrb[5].mxu0 }
 0x10f   :  { %v491_v5 = vpop.f32.mrb[6].mxu0 }
 0x110   :  { %v492_v6 = vadd.f32 %v491_v5, %v451_v1  ;;  %v681_v7 = vpop.f32.mrb[7].mxu0  ;;  %v496_v8 = vsel %vm495_vm3, %v489_v3, 0.0 }
 0x111   :  { %497 = vadd.xlane.f32.xlu1 %v496_v8 }
 0x112   :  { %v499_v9 = vsel %vm495_vm3, %v492_v6, 0.0 }
 0x115   :  { %500 = vadd.xlane.f32.xlu1 %v499_v9 }
 0x126   :  { %527 = vperm.xlu1 %686, %v523_v10  }
 0x12a   :  { %532 = vperm.xlu1 %686, %v524_v11  }
 0x12e   :  { %541 = vperm.xlu1 %686, %v537_v12  }
 0x19e   :  { %v498_v13 = vpop.xlane.xlu1 %497 }
 0x19f   :  { %v503_v14 = vmul.f32 0.02, %v498_v13 }
 0x1a1   :  { %v505_v15 = vsub.f32 %v489_v3, %v503_v14 }
 0x1a2   :  { %v501_v16 = vpop.xlane.xlu1 %500 }
 0x1a3   :  { %v504_v17 = vmul.f32 0.02, %v501_v16  ;;  %v507_v18 = vmul.f32 %v505_v15, %v505_v15 }
 0x1a5   :  { %v506_v19 = vsub.f32 %v492_v6, %v504_v17  ;;  %v509_v20 = vsel %vm495_vm3, %v507_v18, 0.0 }
 0x1a6   :  { %510 = vadd.xlane.f32.xlu0 %v509_v20  ;;  %v528_v24 = vpop.permute.xlu1 %527 }
 0x1a7   :  { %v508_v21 = vmul.f32 %v506_v19, %v506_v19 }
 0x1a9   :  { %v512_v22 = vsel %vm495_vm3, %v508_v21, 0.0 }
 0x1aa   :  { %513 = vadd.xlane.f32.xlu1 %v512_v22  ;;  %v533_v25 = vpop.permute.xlu1 %532 }
 0x1ae   :  { %v542_v26 = vpop.permute.xlu1 %541 }
 0x1bb   :  { %546 = vperm.xlu1 %686, %v538_v23  }
 0x233   :  { %v511_v27 = vpop.xlane.xlu0 %510 }
 0x234   :  { %v515_v28 = vmul.f32 0.02, %v511_v27 }
 0x236   :  { %v517_v29 = vadd.f32 1e-05, %v515_v28 }
 0x237   :  { %v514_v30 = vpop.xlane.xlu1 %513 }
 0x238   :  { %732 = vrsqrt.f32 %v517_v29  ;;  %v516_v31 = vmul.f32 0.02, %v514_v30 }
 0x23a   :  { %v518_v32 = vadd.f32 1e-05, %v516_v31 }
 0x23b   :  { %v547_v41 = vpop.permute.xlu1 %546 }
 0x23c   :  { %734 = vrsqrt.f32 %v518_v32 }
 0x242   :  { %v733_v33 = vpop.eup %732 }
 0x243   :  { %v521_v34 = vmul.f32 %v733_v33, %v505_v15 }
 0x245   :  { %v535_v35 = vmul.f32 %v528_v24, %v521_v34 }
 0x246   :  { %v735_v36 = vpop.eup %734 }
 0x247   :  { %v549_v37 = vadd.f32 %v542_v26, %v535_v35  ;;  %v522_v38 = vmul.f32 %v735_v36, %v506_v19 }
 0x249   :  { %v613_v39 = vmul.f32 -1.442695, %v549_v37  ;;  %v536_v40 = vmul.f32 %v533_v25, %v522_v38 }
 0x24b   :  { %736 = vpow2.f32 %v613_v39  ;;  %v550_v42 = vadd.f32 %v547_v41, %v536_v40 }
 0x24d   :  { %v614_v43 = vmul.f32 -1.442695, %v550_v42 }
 0x24f   :  { %738 = vpow2.f32 %v614_v43 }
 0x255   :  { %v737_v44 = vpop.eup %736 }
 0x256   :  { %v557_v45 = vadd.f32 1.0, %v737_v44 }
 0x258   :  { %740 = vrcp.f32 %v557_v45 }
 0x259   :  { %v739_v46 = vpop.eup %738 }
 0x25a   :  { %v558_v47 = vadd.f32 1.0, %v739_v46 }
 0x25c   :  { %742 = vrcp.f32 %v558_v47 }
 0x262   :  { %v741_v48 = vpop.eup %740 }
 0x263   :  { %563 = vst.msk [vmem:[%s941_s5] sm:$0xff] %vm495_vm3, %v741_v48 }
 0x266   :  { %v743_v49 = vpop.eup %742 }
 0x267   :  { %564 = vst.msk [vmem:[%s941_s5 + $0x8] sm:$0xff] %vm495_vm3, %v743_v49 }

// kernel: lenet_bn_forward.5
= control target key start
LH: loop header
LB: loop body
LE: loop exit
PB: predicated region body
PF: predicated region fallthrough
CT: control target
= control target key end

     0   :  { %v902_v1 = vmov 0   ;;  %v110_v21 = vlaneseq  ;;  %v903_v26 = vmov 1966171168   ;;  %vm276_vm0 = vcmask 130048   ;;  %s1149_s0 = inlined_call_operand.vmem [shape: bf16[2,400], index: 0, kind: input, shape index: {}]   ;;  %s1150_s1 = inlined_call_operand.vmem [shape: bf16[400,120], index: 1, kind: input, shape index: {}]   ;;  %s1151_s2 = inlined_call_operand.vmem [shape: f32[1,120], index: 2, kind: input, shape index: {}]   ;;  %s1152_s3 = inlined_call_operand.vmem [shape: f32[1,120], index: 3, kind: input, shape index: {}]   ;;  %s1153_s4 = inlined_call_operand.vmem [shape: f32[1,120], index: 4, kind: input, shape index: {}]   ;;  %s1154_s5 = inlined_call_operand.vmem [shape: bf16[120,84], index: 5, kind: input, shape index: {}]   ;;  %s1155_s6 = inlined_call_operand.vmem [shape: f32[1,84], index: 6, kind: input, shape index: {}]   ;;  %s1156_s7 = inlined_call_operand.vmem [shape: f32[1,84], index: 7, kind: input, shape index: {}]   ;;  %s1157_s8 = inlined_call_operand.vmem [shape: f32[1,84], index: 8, kind: input, shape index: {}]   ;;  %s1158_s9 = inlined_call_operand.vmem [shape: bf16[84,10], index: 9, kind: input, shape index: {}]   ;;  %s1159_s10 = inlined_call_operand.vmem [shape: f32[1,10], index: 10, kind: input, shape index: {}]   ;;  %s1160_s11 = inlined_call_operand.hbm [shape: f32[2,10], index: 11, kind: output, shape index: {}]  }
   0x1   :  { %v823_v0 = vld [vmem:[%s1150_s1 + $0x40] sm:$0xff]   ;;  %320 = vmatprep.subr.bf16.mxu1 %v902_v1  ;;  %v826_v4 = vld [vmem:[%s1150_s1 + $0x48] sm:$0xff]   ;;  %v829_v7 = vld [vmem:[%s1150_s1 + $0x50] sm:$0xff]   ;;  %v108_v27 = vunpack.c.l.s4 %v903_v26 }
   0x2   :  { %v824_v2 = vld [vmem:[%s1150_s1 + $0x80] sm:$0xff]   ;;  %744 = vmatprep.subr.bf16.mxu0 %v823_v0  ;;  %v827_v5 = vld [vmem:[%s1150_s1 + $0x88] sm:$0xff]   ;;  %v830_v8 = vld [vmem:[%s1150_s1 + $0x90] sm:$0xff]   ;;  %v111_v28 = vshrl.u32 %v110_v21, 7 }
   0x3   :  { %v825_v3 = vld [vmem:[%s1150_s1] sm:$0xff]   ;;  %321 = vmatpush1.bf16.msra.mxu1 %v824_v2  ;;  %v828_v6 = vld [vmem:[%s1150_s1 + $0x8] sm:$0xff]   ;;  %v831_v9 = vld [vmem:[%s1150_s1 + $0x10] sm:$0xff]   ;;  %v109_v31 = vunpack.c.0.s8 %v108_v27 }
   0x4   :  { %745 = vmatpush3.bf16.msra.mxu0 %v825_v3  ;;  %322 = vmatprep.subr.bf16.mxu1 %v902_v1  ;;  %v832_v10 = vld [vmem:[%s1150_s1 + $0x58] sm:$0xff]   ;;  %v835_v13 = vld [vmem:[%s1150_s1 + $0x60] sm:$0xff]   ;;  %v838_v16 = vld [vmem:[%s1150_s1 + $0x68] sm:$0xff]  }
   0x5   :  { %746 = vmatprep.subr.bf16.mxu0 %v826_v4  ;;  %v833_v11 = vld [vmem:[%s1150_s1 + $0x98] sm:$0xff]   ;;  %v836_v14 = vld [vmem:[%s1150_s1 + $0xa0] sm:$0xff]   ;;  %v839_v17 = vld [vmem:[%s1150_s1 + $0xa8] sm:$0xff]   ;;  %v112_v32 = vsub.s32 %v109_v31, %v111_v28 }
   0x6   :  { %v834_v12 = vld [vmem:[%s1150_s1 + $0x18] sm:$0xff]   ;;  %v837_v15 = vld [vmem:[%s1150_s1 + $0x20] sm:$0xff]   ;;  %v840_v18 = vld [vmem:[%s1150_s1 + $0x28] sm:$0xff]  }
   0x7   :  { %323 = vmatpush1.bf16.msra.mxu1 %v827_v5  ;;  %v841_v19 = vld [vmem:[%s1150_s1 + $0x70] sm:$0xff]   ;;  %v844_v23 = vld [vmem:[%s1150_s1 + $0x78] sm:$0xff]   ;;  %v693_v24 = vld.sshfl [vmem:[%s1149_s0] sm:$0x33 pattern:$0x75316420] }
   0x8   :  { %747 = vmatpush3.bf16.msra.mxu0 %v828_v6  ;;  %324 = vmatprep.subr.bf16.mxu1 %v902_v1  ;;  %v842_v20 = vld [vmem:[%s1150_s1 + $0xb0] sm:$0xff]   ;;  %v845_v25 = vld [vmem:[%s1150_s1 + $0xb8] sm:$0xff]   ;;  %v106_v30 = vcombine.high %v693_v24, %v693_v24  ;;  %v847_v33 = vld [vmem:[%s1150_s1 + $0xc0] sm:$0xff]   ;;  %v113_v35 = vrot.slane %v693_v24, %v112_v32 }
   0x9   :  { %748 = vmatprep.subr.bf16.mxu0 %v829_v7  ;;  %v843_v22 = vld [vmem:[%s1150_s1 + $0x30] sm:$0xff]   ;;  %v846_v29 = vld [vmem:[%s1150_s1 + $0x38] sm:$0xff]  }
   0xa   :  { %v120_v34 = vrot.slane %v106_v30, %v112_v32  ;;  %v121_v37 = vcombine.high %v113_v35, %v113_v35 }
   0xb   :  { %325 = vmatpush1.bf16.msra.mxu1 %v830_v8 }
   0xc   :  { %749 = vmatpush3.bf16.msra.mxu0 %v831_v9  ;;  %326 = vmatprep.subr.bf16.mxu1 %v902_v1  ;;  %v122_v36 = vcombine.high %v120_v34, %v120_v34 }
   0xd   :  { %750 = vmatprep.subr.bf16.mxu0 %v832_v10  ;;  %312 = vmatprep.mubr.bf16.mxu0 %v120_v34 }
   0xf   :  { %327 = vmatpush1.bf16.msra.mxu1 %v833_v11 }
  0x10   :  { %751 = vmatpush3.bf16.msra.mxu0 %v834_v12  ;;  %328 = vmatprep.subr.bf16.mxu1 %v902_v1 }
  0x11   :  { %752 = vmatprep.subr.bf16.mxu0 %v835_v13 }
  0x13   :  { %329 = vmatpush1.bf16.msra.mxu1 %v836_v14 }
  0x14   :  { %753 = vmatpush3.bf16.msra.mxu0 %v837_v15  ;;  %330 = vmatprep.subr.bf16.mxu1 %v902_v1 }
  0x15   :  { %754 = vmatprep.subr.bf16.mxu0 %v838_v16 }
  0x17   :  { %331 = vmatpush1.bf16.msra.mxu1 %v839_v17 }
  0x18   :  { %755 = vmatpush3.bf16.msra.mxu0 %v840_v18  ;;  %332 = vmatprep.subr.bf16.mxu1 %v902_v1 }
  0x19   :  { %756 = vmatprep.subr.bf16.mxu0 %v841_v19 }
  0x1b   :  { %333 = vmatpush1.bf16.msra.mxu1 %v842_v20 }
  0x1c   :  { %757 = vmatpush3.bf16.msra.mxu0 %v843_v22  ;;  %334 = vmatprep.subr.bf16.mxu1 %v902_v1 }
  0x1d   :  { %758 = vmatprep.subr.bf16.mxu0 %v844_v23 }
  0x1f   :  { %335 = vmatpush1.bf16.msra.mxu1 %v845_v25 }
  0x20   :  { %759 = vmatpush3.bf16.msra.mxu0 %v846_v29  ;;  %336 = vmatprep.subr.bf16.mxu1 %v902_v1 }
  0x21   :  { %16 = vsyncpa [#allocation3], 0  ;;  %719 = vmatprep.mubr.msk.bf16.mxu1 %vm276_vm0, %v122_v36  ;;  %v848_v38 = vld [vmem:[%s1154_s5] sm:$0xff]   ;;  %v904_v39 = vmov 0.0   ;;  %v849_v40 = vld [vmem:[%s1154_s5 + $0x8] sm:$0xff]   ;;  %vm905_vm1 = vmmov 0  }
  0x22   :  { %782 = vmatprep.subr.bf16.mxu0 %v904_v39  ;;  %v850_v41 = vld [vmem:[%s1154_s5 + $0x10] sm:$0xff]   ;;  %v851_v42 = vld [vmem:[%s1154_s5 + $0x18] sm:$0xff]   ;;  %v852_v43 = vld [vmem:[%s1154_s5 + $0x20] sm:$0xff]   ;;  %vm477_vm2 = vcmask 1043456   ;;  %vm362_vm3 = vcmask 975872   ;;  %vm473_vm4 = vcmask 982016  }
  0x23   :  { %313 = vmatmul.mubr.bf16.vlgmr.msra.gmra.mrb[0].mxu0 %v113_v35  ;;  %337 = vmatpush1.bf16.msra.mxu1 %v847_v33  ;;  %v853_v44 = vld [vmem:[%s1154_s5 + $0x28] sm:$0xff]   ;;  %v854_v45 = vld [vmem:[%s1154_s5 + $0x30] sm:$0xff]   ;;  %v855_v46 = vld [vmem:[%s1154_s5 + $0x38] ss:$0 sps:$4 sm:$0xff]   ;;  %vm621_vm5 = vcmask 1041408   ;;  %vm523_vm6 = vcmask 680960  }
  0x24   :  { %802 = vmatprep.subr.bf16.mxu1 %v904_v39  ;;  %783 = vmatpush3.bf16.msra.mxu0 %v848_v38  ;;  %v479_v47 = vsel %vm477_vm2, %v855_v46, 0  ;;  %v692_v50 = vld [vmem:[%s1151_s2] ss:$0 sm:$0xff]  ;;  %v857_v27 = vld [vmem:[%s1158_s9 + $0x8] sm:$0xff]   ;;  %v858_v28 = vld [vmem:[%s1158_s9 + $0x10] sm:$0xff]   ;;  %vm617_vm7 = vcmask 687104  }
  0x25   :  { %784 = vmatprep.subr.bf16.mxu0 %v904_v39  ;;  %798 = vmatprep.mubr.msk.bf16.mxu0 %vm905_vm1, %v904_v39  ;;  %v720_v15 = vld [vmem:[%s1152_s3] ss:$0 sm:$0xff]  ;;  %v859_v29 = vld [vmem:[%s1158_s9 + $0x18] sm:$0xff]   ;;  %v861_v31 = vld [vmem:[%s1158_s9 + $0x28] ss:$0 sps:$4 sm:$0x33]  }
  0x26   :  { %353 = vmatmul.mubr.bf16.vlgmr.msra.gmra.mrb[0].mxu1 %v121_v37  ;;  %v721_v18 = vld [vmem:[%s1153_s4] ss:$0 sm:$0xff]  ;;  %v623_v32 = vsel %vm621_vm5, %v861_v31, 0  ;;  %vm665_vm8 = vcmask 74752  }
  0x27   :  { %814 = vmatprep.mubr.msk.bf16.mxu1 %vm905_vm1, %v904_v39  ;;  %v856_v26 = vld [vmem:[%s1158_s9] sm:$0xff]  }
  0x28   :  { %785 = vmatpush3.bf16.msra.mxu0 %v849_v40  ;;  %803 = vmatpush3.bf16.msra.mxu1 %v856_v26  ;;  %v860_v30 = vld [vmem:[%s1158_s9 + $0x20] sm:$0xff]  }
  0x29   :  { %786 = vmatprep.subr.bf16.mxu0 %v904_v39  ;;  %804 = vmatprep.subr.bf16.mxu1 %v904_v39  ;;  %v723_v33 = vld [vmem:[%s1155_s6] ss:$0 sm:$0xff] }
  0x2c   :  { %787 = vmatpush3.bf16.msra.mxu0 %v850_v41  ;;  %805 = vmatpush3.bf16.msra.mxu1 %v857_v27 }
  0x2d   :  { %788 = vmatprep.subr.bf16.mxu0 %v904_v39  ;;  %806 = vmatprep.subr.bf16.mxu1 %v904_v39 }
  0x30   :  { %789 = vmatpush3.bf16.msra.mxu0 %v851_v42  ;;  %807 = vmatpush3.bf16.msra.mxu1 %v858_v28 }
  0x31   :  { %790 = vmatprep.subr.bf16.mxu0 %v904_v39  ;;  %808 = vmatprep.subr.bf16.mxu1 %v904_v39 }
  0x34   :  { %791 = vmatpush3.bf16.msra.mxu0 %v852_v43  ;;  %809 = vmatpush3.bf16.msra.mxu1 %v859_v29 }
  0x35   :  { %792 = vmatprep.subr.bf16.mxu0 %v904_v39  ;;  %810 = vmatprep.subr.bf16.mxu1 %v904_v39 }
  0x38   :  { %793 = vmatpush3.bf16.msra.mxu0 %v853_v44  ;;  %811 = vmatpush3.bf16.msra.mxu1 %v860_v30 }
  0x39   :  { %794 = vmatprep.subr.bf16.mxu0 %v904_v39  ;;  %812 = vmatprep.subr.bf16.mxu1 %v904_v39 }
  0x3c   :  { %795 = vmatpush3.bf16.msra.mxu0 %v854_v45  ;;  %813 = vmatpush3.bf16.msra.mxu1 %v623_v32 }
  0x3d   :  { %796 = vmatprep.subr.bf16.mxu0 %v904_v39 }
  0x40   :  { %797 = vmatpush3.bf16.msra.mxu0 %v479_v47 }
  0xf6   :  { %v760_v48 = vpop.f32.mrb[0].mxu0 }
  0xf7   :  { %v761_v49 = vpop.f32.mrb[1].mxu0 }
  0xf8   :  { %v762_v51 = vadd.f32 %v761_v49, %v760_v48  ;;  %v763_v52 = vpop.f32.mrb[2].mxu0 }
  0xf9   :  { %v764_v53 = vpop.f32.mrb[3].mxu0  ;;  %v354_v54 = vpop.f32.mrb[0].mxu1 }
  0xfa   :  { %v315_v55 = vadd.f32 %v762_v51, %v692_v50  ;;  %v356_v56 = vpop.f32.mrb[1].mxu1 }
  0xfb   :  { %v357_v57 = vpop.f32.mrb[2].mxu1 }
  0xfc   :  { %v355_v58 = vadd.f32 %v354_v54, %v315_v55  ;;  %v358_v59 = vpop.f32.mrb[3].mxu1 }
  0xfe   :  { %v363_v60 = vsel %vm362_vm3, %v355_v58, 0.0 }
  0xff   :  { %v364_v61 = vrot.slane %v363_v60, 4 }
 0x101   :  { %v365_v62 = vadd.f32 %v364_v61, %v363_v60  ;;  %v734_v61 = vld [vmem:[%s1157_s8] ss:$0 sm:$0xff] }
 0x103   :  { %v366_v63 = vrot.slane %v365_v62, 2 }
 0x105   :  { %v367_v0 = vadd.f32 %v366_v63, %v365_v62 }
 0x107   :  { %v368_v1 = vrot.slane %v367_v0, 1 }
 0x109   :  { %v369_v2 = vadd.f32 %v368_v1, %v367_v0 }
 0x10b   :  { %v371_v3 = vmul.f32 0.5, %v369_v2 }
 0x10d   :  { %v372_v4 = vsub.f32 %v355_v58, %v371_v3  ;;  %v733_v58 = vld [vmem:[%s1156_s7] ss:$0 sm:$0xff]  ;;  %s906_s7 = smov [#allocation2]  }
 0x10e   :  { %s684_s8 = sshll.u32 %s906_s7, 4  ;;  %s685_s8 = int_to_ptr.vmem [resolvable:$true] %s684_s8 }
 0x10f   :  { %v373_v5 = vmul.f32 %v372_v4, %v372_v4  ;;  %v388_v16 = vmul.f32 %v720_v15, %v372_v4  ;;  %p883_p1 = scmp.lt.s32.totalorder %s685_s8, %s685_s8 }
 0x111   :  { %v374_v6 = vsel %vm362_vm3, %v373_v5, 0.0  ;;  %v736_v5 = vld [vmem:[%s1159_s10] ss:$0 sm:$0xff]  ;;  %s878_s10 = scalar_lea.vmem %s685_s8, 32 }
 0x112   :  { %v375_v7 = vrot.slane %v374_v6, 4  ;;  %p879_p0 = scmp.ne.s32.totalorder %s685_s8, %s878_s10  ;;  %p884_p2 = scmp.lt.s32.totalorder %s878_s10, %s878_s10 }
 0x114   :  { %v376_v8 = vadd.f32 %v375_v7, %v374_v6  ;;  %p885_p3 = por %p884_p2, %p883_p1 }
 0x116   :  { %v377_v9 = vrot.slane %v376_v8, 2  ;;  %p886_p4 = pnand %p885_p3, %p879_p0 }
 0x118   :  { %v378_v10 = vadd.f32 %v377_v9, %v376_v8 }
 0x11a   :  { %v379_v11 = vrot.slane %v378_v10, 1 }
 0x11c   :  { %v380_v12 = vadd.f32 %v379_v11, %v378_v10 }
 0x11e   :  { %v381_v13 = vmul.f32 0.5, %v380_v12 }
 0x120   :  { %v389_v14 = vadd.f32 1e-05, %v381_v13 }
 0x122   :  { %862 = vrsqrt.f32 %v389_v14 }
 0x12c   :  { %v863_v17 = vpop.eup %862 }
 0x12d   :  { %v391_v19 = vmul.f32 %v863_v17, %v388_v16 }
 0x12f   :  { %v398_v20 = vadd.f32 %v721_v18, %v391_v19 }
 0x131   :  { %v722_v21 = vmul.f32 -1.442695, %v398_v20 }
 0x133   :  { %864 = vpow2.f32 %v722_v21 }
 0x13d   :  { %v865_v22 = vpop.eup %864 }
 0x13e   :  { %v402_v23 = vadd.f32 1.0, %v865_v22 }
 0x140   :  { %866 = vrcp.f32 %v402_v23 }
 0x14a   :  { %v867_v24 = vpop.eup %866 }
 0x14b   :  { %v405_v25 = vpack.c.bf16 %v867_v24, %v867_v24 }
 0x14d   :  { %799 = vmatmul.mubr.msk.bf16.vlgmr.msra.gmra.mrb[4].mxu0 %vm473_vm4, %v405_v25 }
 0x220   :  { %v515_v34 = vpop.f32.mrb[4].mxu0 }
 0x221   :  { %v516_v35 = vadd.f32 %v723_v33, %v515_v34  ;;  %v800_v36 = vpop.f32.mrb[5].mxu0 }
 0x222   :  { %v518_v37 = vpop.f32.mrb[6].mxu0 }
 0x223   :  { %v524_v38 = vsel %vm523_vm6, %v516_v35, 0.0  ;;  %v801_v40 = vpop.f32.mrb[7].mxu0 }
 0x224   :  { %v525_v41 = vrot.slane %v524_v38, 4 }
 0x226   :  { %v526_v42 = vadd.f32 %v525_v41, %v524_v38 }
 0x228   :  { %v527_v43 = vrot.slane %v526_v42, 2 }
 0x22a   :  { %v528_v44 = vadd.f32 %v527_v43, %v526_v42 }
 0x22c   :  { %v529_v45 = vrot.slane %v528_v44, 1 }
 0x22e   :  { %v530_v46 = vadd.f32 %v529_v45, %v528_v44 }
 0x230   :  { %v531_v39 = vmul.f32 0.5, %v530_v46 }
 0x232   :  { %v532_v47 = vsub.f32 %v516_v35, %v531_v39 }
 0x234   :  { %v533_v48 = vmul.f32 %v532_v47, %v532_v47  ;;  %v548_v59 = vmul.f32 %v733_v58, %v532_v47 }
 0x236   :  { %v534_v49 = vsel %vm523_vm6, %v533_v48, 0.0 }
 0x237   :  { %v535_v50 = vrot.slane %v534_v49, 4 }
 0x239   :  { %v536_v51 = vadd.f32 %v535_v50, %v534_v49 }
 0x23b   :  { %v537_v52 = vrot.slane %v536_v51, 2 }
 0x23d   :  { %v538_v53 = vadd.f32 %v537_v52, %v536_v51 }
 0x23f   :  { %v539_v54 = vrot.slane %v538_v53, 1 }
 0x241   :  { %v540_v55 = vadd.f32 %v539_v54, %v538_v53 }
 0x243   :  { %v541_v56 = vmul.f32 0.5, %v540_v55 }
 0x245   :  { %v549_v57 = vadd.f32 1e-05, %v541_v56 }
 0x247   :  { %868 = vrsqrt.f32 %v549_v57 }
 0x251   :  { %v869_v60 = vpop.eup %868 }
 0x252   :  { %v551_v62 = vmul.f32 %v869_v60, %v548_v59 }
 0x254   :  { %v558_v63 = vadd.f32 %v734_v61, %v551_v62 }
 0x256   :  { %v735_v0 = vmul.f32 -1.442695, %v558_v63 }
 0x258   :  { %870 = vpow2.f32 %v735_v0 }
 0x262   :  { %v871_v1 = vpop.eup %870 }
 0x263   :  { %v562_v2 = vadd.f32 1.0, %v871_v1 }
 0x265   :  { %872 = vrcp.f32 %v562_v2 }
 0x26f   :  { %v873_v3 = vpop.eup %872 }
 0x270   :  { %v565_v4 = vpack.c.bf16 %v873_v3, %v873_v3 }
 0x272   :  { %815 = vmatmul.mubr.msk.bf16.vlgmr.msra.gmra.mrb[4].mxu1 %vm617_vm7, %v565_v4 }
 0x345   :  { %v659_v6 = vpop.f32.mrb[4].mxu1 }
 0x346   :  { %v660_v7 = vadd.f32 %v736_v5, %v659_v6  ;;  %v816_v8 = vpop.f32.mrb[5].mxu1 }
 0x347   :  { %v662_v9 = vpop.f32.mrb[6].mxu1 }
 0x348   :  { %v817_v10 = vpop.f32.mrb[7].mxu1  ;;  %v666_v11 = vsel %vm665_vm8, %v660_v7, -inf }
 0x349   :  { %667 = vmax.xlane.f32.xlu0 %v666_v11 }
 0x3d6   :  { %v668_v12 = vpop.xlane.xlu0 %667 }
 0x3d7   :  { %v669_v13 = vsub.f32 %v660_v7, %v668_v12 }
 0x3d9   :  { %v670_v14 = vmul.f32 1.442695, %v669_v13 }
 0x3db   :  { %874 = vpow2.f32 %v670_v14 }
 0x3e5   :  { %v875_v15 = vpop.eup %874 }
 0x3e6   :  { %v672_v16 = vsel %vm665_vm8, %v875_v15, 0.0 }
 0x3e7   :  { %673 = vadd.xlane.f32.xlu0 %v672_v16 }
 0x474   :  { %v674_v17 = vpop.xlane.xlu0 %673 }
 0x475   :  { %876 = vrcp.f32 %v674_v17 }
 0x47f   :  { %v877_v18 = vpop.eup %876 }
 0x480   :  { %v676_v19 = vmul.f32 %v877_v18, %v875_v15 }
 0x482   :  { %677 = vst.msk [vmem:[#allocation2] sm:$0x3] %vm665_vm8, %v676_v19 }
 0x483   :  { %889 = shalt.err (!%p886_p4)
}
 0x484   :  { %s890_s27 = scalar_lea.hbm %s1160_s11, 32 }
 0x485   :  { %p891_p5 = scmp.ne.s32.totalorder %s1160_s11, %s890_s27  ;;  %p894_p6 = scmp.lt.u32.totalorder %s890_s27, %s1160_s11 }
 0x487   :  { %p896_p7 = pnand %p894_p6, %p891_p5 }
 0x489   :  { %899 = shalt.err (!%p896_p7)
}
 0x48a   :  { %687 = dma.vmem_to_hbm [thread:$0]  %s685_s8, 32, %s1160_s11, [#allocation3]  }
 0x48b   :  { %900 = dma.done.wait [#allocation3], 32  }
 0x48c   :  { %901 = vsyncadd [#allocation3], 4294967264 }
 0x48d   :  { %691 = vsyncpa [#allocation3], 1 }

</bundles_post_ra>
